<compile_context>
chip_gen: v6e
topology: v6e:2x2x1
jax: 0.10.0
libtpu: 0.0.40
codegen_flags: <defaults>
</compile_context>

<pallas_src>
import math

import jax
import jax.numpy as jnp
from jax import lax
from jax.experimental import pallas as pl
from jax.experimental.pallas import tpu as pltpu

BN_EPS = 1e-5


def _round_up(a, b):
    return ((a + b - 1) // b) * b


# --------------------------------------------------------------------------
# Fused kernel: BN-affine + ReLU + (1x1 conv ∘ 2x2 avg-pool) == one matmul
# --------------------------------------------------------------------------
def _bn_relu_conv_pool_kernel(x_ref, scale_ref, shift_ref, w_ref, o_ref):
    # x_ref:     (TP, Kp)      bf16; one row per 2x2 output window, features
    #                          ordered (window position, padded input channel)
    # scale_ref: (1, Kp)       f32; gamma / sqrt(var + eps), tiled 4x, 0-padded
    # shift_ref: (1, Kp)       f32; beta - mean * scale,     tiled 4x, 0-padded
    # w_ref:     (Kp, Cout_p)  bf16; 1x1 conv weight tiled 4x, *0.25, 0-padded
    # o_ref:     (TP, Cout_p)  f32
    x = x_ref[...].astype(jnp.float32)
    act = jnp.maximum(x * scale_ref[...] + shift_ref[...], 0.0)
    o_ref[...] = jnp.dot(act.astype(jnp.bfloat16), w_ref[...],
                         preferred_element_type=jnp.float32)


# --------------------------------------------------------------------------
# Wrapper
# --------------------------------------------------------------------------
def transition_forward(x_nchw, gamma, beta, w_oihw, *, tile_rows=1024):
    """x_nchw: (N, Cin, H, W); w_oihw: (Cout, Cin, 1, 1). Returns NCHW."""
    x_nchw = x_nchw.astype(jnp.float32)
    N, Cin, H, W = x_nchw.shape
    Cout = w_oihw.shape[0]
    H2, W2 = H // 2, W // 2          # avg_pool2d(.., 2) floors odd extents
    P = N * H2 * W2

    # Lane padding: K = 4*Cin_p multiple of 128; Cout_p multiple of 128.
    Cin_p = _round_up(Cin, 32)
    Kp = 4 * Cin_p
    Cout_p = _round_up(Cout, 128)

    # ---- BatchNorm batch statistics in a single fused pass over x
    #      (biased variance, train-mode forward).
    cnt = N * H * W
    s1 = jnp.sum(x_nchw, axis=(0, 2, 3))
    s2 = jnp.sum(x_nchw * x_nchw, axis=(0, 2, 3))
    mean = s1 / cnt
    var = jnp.maximum(s2 / cnt - mean * mean, 0.0)
    scale = gamma.astype(jnp.float32) / jnp.sqrt(var + BN_EPS)
    shift = beta.astype(jnp.float32) - mean * scale

    # ---- Layout: NCHW -> (P, Kp) bf16; one row per 2x2 pooling window.
    #      Channel pad + bf16 cast fuse into the single transpose pass.
    xc = x_nchw[:, :, :2 * H2, :2 * W2]
    if Cin_p != Cin:
        xc = jnp.pad(xc, ((0, 0), (0, Cin_p - Cin), (0, 0), (0, 0)))
    xr = xc.reshape(N, Cin_p, H2, 2, W2, 2)
    xr = jnp.transpose(xr, (0, 2, 4, 3, 5, 1))       # (N, H2, W2, ph, pw, Cin_p)
    x2d = xr.reshape(P, Kp).astype(jnp.bfloat16)

    # ---- Expanded per-feature affine (f32) and pool-fused conv weight (bf16).
    scale_p = jnp.zeros((Cin_p,), jnp.float32).at[:Cin].set(scale)
    shift_p = jnp.zeros((Cin_p,), jnp.float32).at[:Cin].set(shift)
    scale_e = jnp.tile(scale_p, 4).reshape(1, Kp)
    shift_e = jnp.tile(shift_p, 4).reshape(1, Kp)

    w_mat = w_oihw[:, :, 0, 0].astype(jnp.float32)               # (Cout, Cin)
    w_pad = jnp.zeros((Cout_p, Cin_p), jnp.float32).at[:Cout, :Cin].set(w_mat)
    w_exp = jnp.tile(w_pad.T * 0.25, (4, 1)).astype(jnp.bfloat16)  # (Kp, Cout_p)

    # ---- Tile selection: rows multiple of 8, at least 2 grid steps when
    #      possible (so v7x's 2 TensorCores both get work).
    if P <= 8:
        TP = P
    else:
        n_tiles = max(2, pl.cdiv(P, tile_rows))
        TP = min(_round_up(pl.cdiv(P, n_tiles), 8), _round_up(P, 8))
    grid = (pl.cdiv(P, TP),)

    # ---- VMEM budget: actual double-buffered tile sizes + slack, capped so
    #      it fits v7x's 64 MiB physical VMEM.
    vmem_bytes = (2 * TP * Kp * 2            # x2d tile (bf16), double-buffered
                  + 2 * Kp * Cout_p * 2      # weight (bf16)
                  + 2 * TP * Cout_p * 4      # output tile (f32)
                  + 2 * 2 * Kp * 4           # scale + shift (f32)
                  + TP * Kp * 4              # f32 activation intermediate
                  + (8 << 20))               # compiler scratch slack
    vmem_bytes = int(min(vmem_bytes, 48 << 20))

    out2d = pl.pallas_call(
        _bn_relu_conv_pool_kernel,
        out_shape=jax.ShapeDtypeStruct((P, Cout_p), jnp.float32),
        grid=grid,
        in_specs=[
            pl.BlockSpec((TP, Kp), lambda i: (i, 0)),
            pl.BlockSpec((1, Kp), lambda i: (0, 0)),
            pl.BlockSpec((1, Kp), lambda i: (0, 0)),
            pl.BlockSpec((Kp, Cout_p), lambda i: (0, 0)),
        ],
        out_specs=pl.BlockSpec((TP, Cout_p), lambda i: (i, 0)),
        compiler_params=pltpu.CompilerParams(
            dimension_semantics=("parallel",),
            vmem_limit_bytes=vmem_bytes,
        ),
    )(x2d, scale_e, shift_e, w_exp)

    out = out2d[:, :Cout].reshape(N, H2, W2, Cout)
    return jnp.transpose(out, (0, 3, 1, 2))          # back to NCHW


# --------------------------------------------------------------------------
# Pure-JAX reference (correctness check only)
# --------------------------------------------------------------------------
def ref_forward(x, gamma, beta, w):
    m = x.mean(axis=(0, 2, 3), keepdims=True)
    v = x.var(axis=(0, 2, 3), keepdims=True)
    h = (x - m) / jnp.sqrt(v + BN_EPS) * gamma.reshape(1, -1, 1, 1) \
        + beta.reshape(1, -1, 1, 1)
    h = jax.nn.relu(h)
    h = lax.conv_general_dilated(
        h, w, (1, 1), 'VALID', dimension_numbers=('NCHW', 'OIHW', 'NCHW'))
    n, c, hh, ww = h.shape
    h = h[:, :, :hh - hh % 2, :ww - ww % 2]
    h = h.reshape(n, c, hh // 2, 2, ww // 2, 2).mean(axis=(3, 5))
    return h


if __name__ == "__main__":
    key = jax.random.PRNGKey(0)
    N, Cin, H, W = 2, 4, 16, 16
    Cout = 8

    k = jax.random.split(key, 4)
    x = jax.random.normal(k[0], (N, Cin, H, W), jnp.float32)
    gamma = 1.0 + 0.1 * jax.random.normal(k[1], (Cin,), jnp.float32)
    beta = 0.1 * jax.random.normal(k[2], (Cin,), jnp.float32)
    w = jax.random.normal(k[3], (Cout, Cin, 1, 1), jnp.float32) / math.sqrt(Cin)

    fwd = jax.jit(transition_forward)
    out = fwd(x, gamma, beta, w)
    out = jax.block_until_ready(out)

    ref = ref_forward(x, gamma, beta, w)
    assert out.shape == (N, Cout, H // 2, W // 2), out.shape

    # bf16 matmul operands => relaxed tolerance (~1e-2 relative).
    abs_err = float(jnp.max(jnp.abs(out - ref)))
    rel_err = abs_err / (float(jnp.max(jnp.abs(ref))) + 1e-6)
    assert abs_err < 5e-2 or rel_err < 2e-2, (abs_err, rel_err)

    print("KERNEL_OK")
</pallas_src>

<mosaic_0001>
module attributes {stable_mosaic.version = 11 : i64} {
  func.func @_bn_relu_conv_pool_kernel(%arg0: i32, %arg1: memref<64x128xbf16, #tpu.memory_space<vmem>>, %arg2: memref<1x128xf32, #tpu.memory_space<vmem>>, %arg3: memref<1x128xf32, #tpu.memory_space<vmem>>, %arg4: memref<128x128xbf16, #tpu.memory_space<vmem>>, %arg5: memref<64x128xf32, #tpu.memory_space<vmem>>) attributes {dimension_semantics = [#tpu.dimension_semantics<parallel>], iteration_bounds = array<i64: 2>, scalar_prefetch = 0 : i64, scratch_operands = 0 : i64, tpu.core_type = #tpu.core_type<tc>, window_params = [{transform_indices = @transform_0, window_bounds = array<i64: 64, 128>}, {pipeline_mode = #tpu.pipeline_mode<synchronous>, transform_indices = @transform_1, window_bounds = array<i64: 1, 128>}, {pipeline_mode = #tpu.pipeline_mode<synchronous>, transform_indices = @transform_2, window_bounds = array<i64: 1, 128>}, {pipeline_mode = #tpu.pipeline_mode<synchronous>, transform_indices = @transform_3, window_bounds = array<i64: 128, 128>}, {transform_indices = @transform_4, window_bounds = array<i64: 64, 128>}]} {
    %c0 = arith.constant 0 : index
    %c0_0 = arith.constant 0 : index
    %0 = vector.load %arg1[%c0, %c0_0] : memref<64x128xbf16, #tpu.memory_space<vmem>>, vector<64x128xbf16>
    %1 = arith.extf %0 : vector<64x128xbf16> to vector<64x128xf32>
    %c0_1 = arith.constant 0 : index
    %c0_2 = arith.constant 0 : index
    %2 = vector.load %arg2[%c0_1, %c0_2] : memref<1x128xf32, #tpu.memory_space<vmem>>, vector<1x128xf32>
    %3 = vector.broadcast %2 : vector<1x128xf32> to vector<64x128xf32>
    %4 = arith.mulf %1, %3 : vector<64x128xf32>
    %c0_3 = arith.constant 0 : index
    %c0_4 = arith.constant 0 : index
    %5 = vector.load %arg3[%c0_3, %c0_4] : memref<1x128xf32, #tpu.memory_space<vmem>>, vector<1x128xf32>
    %6 = vector.broadcast %5 : vector<1x128xf32> to vector<64x128xf32>
    %7 = arith.addf %4, %6 : vector<64x128xf32>
    %cst = arith.constant 0.000000e+00 : f32
    %8 = vector.broadcast %cst : f32 to vector<64x128xf32>
    %9 = arith.maximumf %7, %8 : vector<64x128xf32>
    %10 = arith.truncf %9 : vector<64x128xf32> to vector<64x128xbf16>
    %c0_5 = arith.constant 0 : index
    %c0_6 = arith.constant 0 : index
    %11 = vector.load %arg4[%c0_5, %c0_6] : memref<128x128xbf16, #tpu.memory_space<vmem>>, vector<128x128xbf16>
    %cst_7 = arith.constant dense<0.000000e+00> : vector<64x128xf32>
    %12 = tpu.matmul %10, %11, %cst_7 {dimension_numbers = #tpu.dot_dimension_numbers<[1], [0], [0], [1], [0, 0, 1, 1], [], []>} : vector<64x128xbf16>, vector<128x128xbf16>, vector<64x128xf32> -> vector<64x128xf32>
    %c0_8 = arith.constant 0 : index
    %c0_9 = arith.constant 0 : index
    %13 = vector.load %arg5[%c0_8, %c0_9] : memref<64x128xf32, #tpu.memory_space<vmem>>, vector<64x128xf32>
    tpu.vector_store %arg5[%c0_8, %c0_9], %12 {strides = array<i32>} : memref<64x128xf32, #tpu.memory_space<vmem>>, vector<64x128xf32>,
    return
  }
  func.func @transform_0(%arg0: i32) -> (i32, i32) {
    %c0_i32 = arith.constant 0 : i32
    %c0_i32_0 = arith.constant 0 : i32
    return %arg0, %c0_i32 : i32, i32
  }
  func.func @transform_1(%arg0: i32) -> (i32, i32) {
    %c0_i32 = arith.constant 0 : i32
    %c0_i32_0 = arith.constant 0 : i32
    %c0_i32_1 = arith.constant 0 : i32
    return %c0_i32, %c0_i32_0 : i32, i32
  }
  func.func @transform_2(%arg0: i32) -> (i32, i32) {
    %c0_i32 = arith.constant 0 : i32
    %c0_i32_0 = arith.constant 0 : i32
    %c0_i32_1 = arith.constant 0 : i32
    return %c0_i32, %c0_i32_0 : i32, i32
  }
  func.func @transform_3(%arg0: i32) -> (i32, i32) {
    %c0_i32 = arith.constant 0 : i32
    %c0_i32_0 = arith.constant 0 : i32
    %c0_i32_1 = arith.constant 0 : i32
    return %c0_i32, %c0_i32_0 : i32, i32
  }
  func.func @transform_4(%arg0: i32) -> (i32, i32) {
    %c0_i32 = arith.constant 0 : i32
    %c0_i32_0 = arith.constant 0 : i32
    return %arg0, %c0_i32 : i32, i32
  }
}

</mosaic_0001>

<bundles_post_ra>
// kernel: tile.18
= control target key start
LH: loop header
LB: loop body
LE: loop exit
PB: predicated region body
PF: predicated region fallthrough
CT: control target
= control target key end

     0   :  { %s22_s0 = inlined_call_operand.vmem [shape: f32[32], index: 0, kind: input, shape index: {}]   ;;  %s23_s1 = inlined_call_operand.vmem [shape: f32[4,32], index: 1, kind: output, shape index: {}]  }
   0x1   :  { %v4_v0 = vld [vmem:[%s22_s0] ss:$0 sm:$0xff] }
   0x2   :  { %5 = vst [vmem:[%s23_s1] sm:$0xf] %v4_v0 }

// kernel: tile.19
= control target key start
LH: loop header
LB: loop body
LE: loop exit
PB: predicated region body
PF: predicated region fallthrough
CT: control target
= control target key end

     0   :  { %vm8_vm0 = vcmask 261120   ;;  %s40_s8 = smov 32   ;;  %s41_s9 = smov 64   ;;  %vm14_vm1 = vcmask 1048320   ;;  %vm20_vm2 = vcmask 785920   ;;  %vm26_vm3 = vcmask 523520   ;;  %s58_s0 = inlined_call_operand.vmem [shape: f32[4,32], index: 0, kind: input, shape index: {}]   ;;  %s59_s1 = inlined_call_operand.vmem [shape: f32[1,128], index: 1, kind: output, shape index: {}]  }
   0x1   :  { %v5_v0 = vld [vmem:[%s58_s0] sm:$0xf]  ;;  %s39_s0 = smov 96  }
   0x2   :  { %6 = vst [vmem:[#allocation1] sm:$0xf] %v5_v0 }
   0x9   :  { %v11_v1 = vld [vmem:[#allocation1 + $0x3] sm:$0x1]   ;;  %v23_v2 = vld [vmem:[#allocation1 + $0x1] sm:$0x1]   ;;  %v7_v3 = vld [vmem:[#allocation1] sm:$0x1]  }
   0xa   :  { %12 = vrot.lane.b32.xlu0 %v11_v1, %s39_s0  ;;  %24 = vrot.lane.b32.xlu1 %v23_v2, %s40_s8  ;;  %v17_v4 = vld [vmem:[#allocation1 + $0x2] sm:$0x1]   ;;  %9 = vst.msk [vmem:[#allocation0] sm:$0x1] %vm8_vm0, %v7_v3  }
   0xe   :  { %18 = vrot.lane.b32.xlu0 %v17_v4, %s41_s9 }
  0x7c   :  { %v13_v5 = vpop.permute.xlu0 %12   ;;  %v25_v6 = vpop.permute.xlu1 %24  }
  0x7d   :  { %15 = vst.msk [vmem:[#allocation0] sm:$0x1] %vm14_vm1, %v13_v5  }
  0x80   :  { %v19_v7 = vpop.permute.xlu0 %18  }
  0x81   :  { %21 = vst.msk [vmem:[#allocation0] sm:$0x1] %vm20_vm2, %v19_v7  }
  0x82   :  { %27 = vst.msk [vmem:[#allocation0] sm:$0x1] %vm26_vm3, %v25_v6  }
  0x89   :  { %v32_v8 = vld [vmem:[#allocation0] sm:$0x1] }
  0x8a   :  { %35 = vst [vmem:[%s59_s1] sm:$0x1] %v32_v8 }

// kernel: transition_forward.1
= control target key start
LH: loop header
LB: loop body
LE: loop exit
PB: predicated region body
PF: predicated region fallthrough
CT: control target
= control target key end

     0   :  { %s594_s15 = smov 0   ;;  %s645_s0 = inlined_call_operand.vmem [shape: bf16[128,128], index: 0, kind: input, shape index: {}]   ;;  %s646_s1 = inlined_call_operand.vmem [shape: f32[1,128], index: 1, kind: input, shape index: {}]   ;;  %s647_s2 = inlined_call_operand.vmem [shape: f32[1,128], index: 2, kind: input, shape index: {}]   ;;  %s648_s3 = inlined_call_operand.vmem [shape: bf16[128,128], index: 3, kind: input, shape index: {}]   ;;  %s649_s4 = inlined_call_operand.vmem [shape: f32[128,128], index: 4, kind: output, shape index: {}]  }
   0x1 LB: > { %s453_s16 = sadd.s32 4294967295, %s567_s15   ;;  %p457_p0 = scmp.ge.s32.totalorder %s567_s15, 1  ;;  %s567_s15 = sphi %s594_s15, %s14_s15  }
   0x2   : > { %p163_p1 = scmp.lt.s32.totalorder %s567_s15, 3 }
   0x4   : > { %p164_p2 = pnand %p457_p0, %p163_p1 }
   0x5   : > { %s458_s19 = sshll.u32 (!%p164_p2), %s453_s16, 3 }
   0x6   : > { %167 = sbr.rel (%p164_p2) target bundleno = 244 (0xf4), region = 36  ;;  %p190_p3 = scmp.lt.s32.totalorder (!%p164_p2), %s458_s19, 15 }
   0xb   : > { %v553_v0 = vld [vmem:[%s648_s3 + $0x38] sm:$0xff]   ;;  %v554_v1 = vld [vmem:[%s648_s3 + $0x30] sm:$0xff]   ;;  %s651_s19 = smov (!%p190_p3, %s458_s19), 15  ;;  %v555_v2 = vld [vmem:[%s648_s3 + $0x28] sm:$0xff]  }
   0xc   : > { %505 = vmatprep.subr.bf16.mxu0 %v553_v0  ;;  %529 = vmatprep.subr.bf16.mxu1 %v553_v0  ;;  %s459_s24 = sshll.u32 %s651_s19, 2  ;;  %v556_v3 = vld [vmem:[%s648_s3 + $0x20] sm:$0xff]   ;;  %v557_v16 = vld [vmem:[%s648_s3 + $0x18] sm:$0xff]   ;;  %v558_v29 = vld [vmem:[%s648_s3 + $0x10] sm:$0xff]   ;;  %s461_s17 = sshll.u32 %s651_s19, 3 }
   0xd   : > { %506 = vmatpush3.bf16.msra.mxu0 %v553_v0  ;;  %537 = vmatpush3.bf16.msra.mxu1 %v553_v0  ;;  %s193_s27 = scalar_lea.vmem %s645_s0, %s459_s24  ;;  %v462_v5 = vld [vmem:[%s646_s1] ss:$0 sm:$0xff]  ;;  %v559_v38 = vld [vmem:[%s648_s3 + $0x8] sm:$0xff]   ;;  %s199_s21 = scalar_lea.vmem %s649_s4, %s461_s17 }
   0xe   : > { %507 = vmatprep.subr.bf16.mxu0 %v554_v1  ;;  %530 = vmatprep.subr.bf16.mxu1 %v554_v1  ;;  %v475_v4 = vld [vmem:[%s193_s27] sm:$0xff]   ;;  %v491_v8 = vld [vmem:[%s193_s27 + $0x10] sm:$0xff]   ;;  %v490_v12 = vld [vmem:[%s193_s27 + $0x8] sm:$0xff]  }
   0xf   : > { %v476_v6 = vunpack.c.l.bf16 %v475_v4  ;;  %v477_v7 = vunpack.c.h.bf16 %v475_v4  ;;  %v463_v9 = vld [vmem:[%s647_s2] ss:$0 sm:$0xff]  ;;  %v484_v10 = vunpack.c.l.bf16 %v491_v8  ;;  %v485_v11 = vunpack.c.h.bf16 %v491_v8  ;;  %v492_v15 = vld [vmem:[%s193_s27 + $0x18] sm:$0xff]  }
  0x10   : > { %v480_v21 = vunpack.c.l.bf16 %v490_v12  ;;  %v481_v22 = vunpack.c.h.bf16 %v490_v12  ;;  %v488_v25 = vunpack.c.l.bf16 %v492_v15  ;;  %v489_v26 = vunpack.c.h.bf16 %v492_v15  ;;  %v560_v43 = vld [vmem:[%s648_s3] sm:$0xff]  }
  0x11   : > { %508 = vmatpush3.bf16.msra.mxu0 %v554_v1  ;;  %538 = vmatpush3.bf16.msra.mxu1 %v554_v1  ;;  %v225_v13 = vmul.f32 %v476_v6, %v462_v5  ;;  %v226_v14 = vmul.f32 %v477_v7, %v462_v5  ;;  %v229_v17 = vmul.f32 %v484_v10, %v462_v5 }
  0x12   : > { %509 = vmatprep.subr.bf16.mxu0 %v555_v2  ;;  %531 = vmatprep.subr.bf16.mxu1 %v555_v2  ;;  %v230_v18 = vmul.f32 %v485_v11, %v462_v5  ;;  %v227_v33 = vmul.f32 %v480_v21, %v462_v5  ;;  %v228_v35 = vmul.f32 %v481_v22, %v462_v5 }
  0x13   : > { %v240_v19 = vadd.f32 %v463_v9, %v225_v13  ;;  %v241_v20 = vadd.f32 %v463_v9, %v226_v14  ;;  %v244_v23 = vadd.f32 %v463_v9, %v229_v17  ;;  %v231_v36 = vmul.f32 %v488_v25, %v462_v5 }
  0x14   : > { %v245_v24 = vadd.f32 %v463_v9, %v230_v18  ;;  %v232_v37 = vmul.f32 %v489_v26, %v462_v5  ;;  %v242_v39 = vadd.f32 %v463_v9, %v227_v33  ;;  %v243_v40 = vadd.f32 %v463_v9, %v228_v35 }
  0x15   : > { %510 = vmatpush3.bf16.msra.mxu0 %v555_v2  ;;  %539 = vmatpush3.bf16.msra.mxu1 %v555_v2  ;;  %v248_v27 = vmax.f32 %v240_v19, 0.0  ;;  %v249_v28 = vmax.f32 %v241_v20, 0.0  ;;  %v252_v30 = vmax.f32 %v244_v23, 0.0  ;;  %v246_v41 = vadd.f32 %v463_v9, %v231_v36 }
  0x16   : > { %511 = vmatprep.subr.bf16.mxu0 %v556_v3  ;;  %532 = vmatprep.subr.bf16.mxu1 %v556_v3  ;;  %v253_v31 = vmax.f32 %v245_v24, 0.0  ;;  %v247_v42 = vadd.f32 %v463_v9, %v232_v37  ;;  %v250_v44 = vmax.f32 %v242_v39, 0.0  ;;  %v251_v45 = vmax.f32 %v243_v40, 0.0 }
  0x17   : > { %v256_v32 = vpack.c.bf16 %v249_v28, %v248_v27  ;;  %v254_v46 = vmax.f32 %v246_v41, 0.0 }
  0x18   : > { %v258_v34 = vpack.c.bf16 %v253_v31, %v252_v30  ;;  %v255_v47 = vmax.f32 %v247_v42, 0.0  ;;  %v257_v48 = vpack.c.bf16 %v251_v45, %v250_v44 }
  0x19   : > { %512 = vmatpush3.bf16.msra.mxu0 %v556_v3  ;;  %540 = vmatpush3.bf16.msra.mxu1 %v556_v3 }
  0x1a   : > { %513 = vmatprep.subr.bf16.mxu0 %v557_v16  ;;  %533 = vmatprep.subr.bf16.mxu1 %v557_v16  ;;  %v259_v49 = vpack.c.bf16 %v255_v47, %v254_v46 }
  0x1b   : > { %521 = vmatprep.mubr.bf16.mxu0 %v256_v32  ;;  %525 = vmatprep.mubr.bf16.mxu1 %v258_v34 }
  0x1d   : > { %514 = vmatpush3.bf16.msra.mxu0 %v557_v16  ;;  %541 = vmatpush3.bf16.msra.mxu1 %v557_v16 }
  0x1e   : > { %515 = vmatprep.subr.bf16.mxu0 %v558_v29  ;;  %534 = vmatprep.subr.bf16.mxu1 %v558_v29 }
  0x21   : > { %516 = vmatpush3.bf16.msra.mxu0 %v558_v29  ;;  %542 = vmatpush3.bf16.msra.mxu1 %v558_v29 }
  0x22   : > { %517 = vmatprep.subr.bf16.mxu0 %v559_v38  ;;  %535 = vmatprep.subr.bf16.mxu1 %v559_v38 }
  0x25   : > { %518 = vmatpush3.bf16.msra.mxu0 %v559_v38  ;;  %543 = vmatpush3.bf16.msra.mxu1 %v559_v38 }
  0x26   : > { %519 = vmatprep.subr.bf16.mxu0 %v560_v43  ;;  %536 = vmatprep.subr.bf16.mxu1 %v560_v43 }
  0x29   : > { %520 = vmatpush3.bf16.msra.mxu0 %v560_v43  ;;  %544 = vmatpush3.bf16.msra.mxu1 %v560_v43 }
  0x2c   : > { %522 = vmatmul.mubr.bf16.vlgmr.msra.gmra.mxu0 %v257_v48  ;;  %526 = vmatmul.mubr.bf16.vlgmr.msra.gmra.mxu1 %v259_v49 }
  0xec   : > { %v523_v50 = vpop.f32.mrf.mxu0  ;;  %v527_v51 = vpop.f32.mrf.mxu1 }
  0xed   : > { %391 = vst [vmem:[%s199_s21 + $0x10] sm:$0xff] %v523_v50  ;;  %395 = vst [vmem:[%s199_s21 + $0x30] sm:$0xff] %v527_v51 }
  0xee   : > { %v358_v52 = vpop.f32.mrf.mxu0  ;;  %v374_v53 = vpop.f32.mrf.mxu1 }
  0xef   : > { %389 = vst [vmem:[%s199_s21] sm:$0xff] %v358_v52  ;;  %393 = vst [vmem:[%s199_s21 + $0x20] sm:$0xff] %v374_v53 }
  0xf0   : > { %v524_v54 = vpop.f32.mrf.mxu0  ;;  %v528_v55 = vpop.f32.mrf.mxu1 }
  0xf1   : > { %392 = vst [vmem:[%s199_s21 + $0x18] sm:$0xff] %v524_v54  ;;  %396 = vst [vmem:[%s199_s21 + $0x38] sm:$0xff] %v528_v55 }
  0xf2   : > { %v361_v56 = vpop.f32.mrf.mxu0  ;;  %v377_v57 = vpop.f32.mrf.mxu1 }
  0xf3   : > { %390 = vst [vmem:[%s199_s21 + $0x8] sm:$0xff] %v361_v56  ;;  %394 = vst [vmem:[%s199_s21 + $0x28] sm:$0xff] %v377_v57 }
  0xf4 PF: > { %s14_s15 = sadd.s32 1, %s567_s15  }
  0xf5   : > { %p11_p4 = scmp.ge.s32.totalorder %s14_s15, 4  }
  0xf7   :  { %13 = sbr.rel (!%p11_p4) target bundleno = 1 (0x1), region = 66 }

</bundles_post_ra>
